<compile_context>
chip_gen: v6e
topology: v6e:2x2x1
jax: 0.10.0
libtpu: 0.0.40
codegen_flags: <defaults>
</compile_context>

<pallas_src>
import math

import jax
import jax.numpy as jnp
from jax.experimental import pallas as pl
from jax.experimental.pallas import tpu as pltpu


NUM_LAYERS = 3


def _round_up(x, m):
    return ((x + m - 1) // m) * m


def _vmem_capacity_bytes():
    try:
        return int(pltpu.get_tpu_info().vmem_capacity_bytes)
    except Exception:
        return 64 << 20  # conservative fallback: v7x per-TensorCore VMEM


def _choose_tk(n_pad, fp_in, fp_h, budget_bytes):
    """Largest 128-multiple K tile dividing n_pad that fits the VMEM budget.

    Trying n_pad itself first gives the A-resident path: the adjacency block
    index is then (0, 0) for every grid step, so A is fetched from HBM exactly
    once for the whole fused 3-layer forward.
    """
    fixed = 4 * (
        2 * n_pad * fp_h      # resident output/accumulator block (double-buffered)
        + n_pad * fp_h        # resident ReLU'd activation scratch
        + 2 * fp_in * fp_h    # W1 block (double-buffered)
        + 2 * fp_h * fp_h     # W2/W3 block (double-buffered)
    )
    for cand in (n_pad, 1024, 512, 256, 128):
        if cand > n_pad or n_pad % cand != 0:
            continue
        per_step = 4 * (
            2 * n_pad * cand      # A column block (double-buffered)
            + 2 * cand * fp_in    # X row block (double-buffered)
        )
        if fixed + per_step <= budget_bytes:
            return cand
    return 128


def _fused_gcn_kernel(a_ref, x_ref, w1_ref, w23_ref, o_ref, h_ref):
    """Grid = (layer l, K-tile k).  Shapes seen inside the kernel:
         a_ref   : [N, tk]          column block of the padded adjacency
         x_ref   : [tk, FP_IN]      row block of the padded input features
         w1_ref  : [FP_IN, FP_H]    padded layer-0 weight
         w23_ref : [1, FP_H, FP_H]  padded weight of layer max(l-1, 0) in {W2, W3}
         o_ref   : [N, FP_H]        VMEM-resident output block == accumulator
         h_ref   : [N, FP_H]        VMEM-resident ReLU'd activation
    """
    l = pl.program_id(0)
    k = pl.program_id(1)
    nl = pl.num_programs(0)
    nk = pl.num_programs(1)
    tk = a_ref.shape[1]
    start = pl.multiple_of(k * tk, 128)  # tk is always a multiple of 128

    # o_ref's block index is (0, 0) for every grid step, so it stays resident
    # in VMEM and is used directly as the float32 accumulator for A @ (h W).
    @pl.when(k == 0)
    def _():
        o_ref[...] = jnp.zeros_like(o_ref)

    # Layer 0: feed the MXU straight from the streamed X tiles (no staging
    # copy through h_ref); X is padded to FP_IN, everything downstream to FP_H.
    @pl.when(l == 0)
    def _():
        hw = jnp.dot(x_ref[...], w1_ref[...], preferred_element_type=jnp.float32)
        o_ref[...] += jnp.dot(a_ref[...], hw, preferred_element_type=jnp.float32)

    # Layers 1..2: read the previous layer's ReLU'd activation from VMEM.
    @pl.when(l > 0)
    def _():
        h_in = h_ref[pl.ds(start, tk), :]
        hw = jnp.dot(h_in, w23_ref[0], preferred_element_type=jnp.float32)
        o_ref[...] += jnp.dot(a_ref[...], hw, preferred_element_type=jnp.float32)

    # After the last K tile of a non-final layer, hand the ReLU'd activation
    # to the next layer.  The final layer leaves its (un-ReLU'd) accumulation
    # in o_ref, which *is* the kernel output -- no extra finalize copy, and no
    # dead ReLU pass on the last step.
    @pl.when(jnp.logical_and(k == nk - 1, l < nl - 1))
    def _():
        h_ref[...] = jnp.maximum(o_ref[...], 0.0)


@jax.jit
def gcn_forward(adj, x, w1, w2, w3):
    n = adj.shape[0]
    f_in, hidden = w1.shape
    n_classes = w3.shape[1]
    assert adj.shape == (n, n)
    assert x.shape == (n, f_in)
    assert w2.shape == (hidden, hidden)
    assert w3.shape == (hidden, n_classes)

    # Per-dimension lane-dense zero padding (exactly result-preserving).
    fp_in = _round_up(f_in, 128)
    fp_h = _round_up(max(hidden, n_classes), 128)
    n_pad = _round_up(n, 128)

    f32 = jnp.float32
    a_p = jnp.zeros((n_pad, n_pad), f32).at[:n, :n].set(adj.astype(f32))
    x_p = jnp.zeros((n_pad, fp_in), f32).at[:n, :f_in].set(x.astype(f32))
    w1_p = jnp.zeros((fp_in, fp_h), f32).at[:f_in, :hidden].set(w1.astype(f32))
    w2_p = jnp.zeros((fp_h, fp_h), f32).at[:hidden, :hidden].set(w2.astype(f32))
    w3_p = jnp.zeros((fp_h, fp_h), f32).at[:hidden, :n_classes].set(w3.astype(f32))
    w23 = jnp.stack([w2_p, w3_p])  # [2, FP_H, FP_H]

    # Per-generation VMEM budget (no universal 64 MiB cap); leave headroom for
    # compiler-internal scratch.
    vmem_cap = _vmem_capacity_bytes()
    budget = (vmem_cap * 3) // 4
    tk = _choose_tk(n_pad, fp_in, fp_h, budget)
    nk = n_pad // tk

    need = 4 * (
        2 * n_pad * tk + 2 * tk * fp_in + 2 * fp_in * fp_h
        + 2 * fp_h * fp_h + 2 * n_pad * fp_h + n_pad * fp_h
    )
    vmem_limit = int(min(vmem_cap - (8 << 20), max(need + (8 << 20), 32 << 20)))
    vmem_limit = max(vmem_limit, 16 << 20)

    last_x_block = nk - 1

    def a_index_map(l, k):
        return (0, k)  # constant (0, 0) when nk == 1 -> A resident in VMEM

    def x_index_map(l, k):
        # Only layer 0 consumes X; pin the index for l > 0 so nothing is
        # re-streamed during layers 1-2 (not even at the layer boundary).
        return (jnp.where(l == 0, k, last_x_block), 0)

    def w1_index_map(l, k):
        return (0, 0)

    def w23_index_map(l, k):
        return (jnp.maximum(l - 1, 0), 0, 0)

    out_p = pl.pallas_call(
        _fused_gcn_kernel,
        out_shape=jax.ShapeDtypeStruct((n_pad, fp_h), jnp.float32),
        grid_spec=pltpu.PrefetchScalarGridSpec(
            num_scalar_prefetch=0,
            grid=(NUM_LAYERS, nk),
            in_specs=[
                pl.BlockSpec((n_pad, tk), a_index_map),        # adjacency column block
                pl.BlockSpec((tk, fp_in), x_index_map),        # input feature row block
                pl.BlockSpec((fp_in, fp_h), w1_index_map),     # W1 (fetched once)
                pl.BlockSpec((1, fp_h, fp_h), w23_index_map),  # W2 / W3 by layer
            ],
            out_specs=pl.BlockSpec((n_pad, fp_h), lambda l, k: (0, 0)),
            scratch_shapes=[
                pltpu.VMEM((n_pad, fp_h), jnp.float32),  # ReLU'd activation h
            ],
        ),
        compiler_params=pltpu.CompilerParams(
            dimension_semantics=("arbitrary", "arbitrary"),
            vmem_limit_bytes=vmem_limit,
        ),
    )(a_p, x_p, w1_p, w23)

    return out_p[:n, :n_classes]


def xavier_uniform(key, fan_in, fan_out):
    bound = math.sqrt(6.0 / (fan_in + fan_out))
    return jax.random.uniform(
        key, (fan_in, fan_out), dtype=jnp.float32, minval=-bound, maxval=bound)


def reference_forward(adj, x, w1, w2, w3):
    h = jnp.maximum((adj @ x) @ w1, 0.0)
    h = jnp.maximum((adj @ h) @ w2, 0.0)
    return (adj @ h) @ w3


def _make_case(key, n, in_dim, hidden_dim, n_classes):
    k_adj, k_feat, k_w1, k_w2, k_w3 = jax.random.split(key, 5)
    # Deterministic symmetric, row-normalized dense adjacency with self loops.
    a_rand = jax.random.uniform(k_adj, (n, n), dtype=jnp.float32)
    a_bin = (a_rand + a_rand.T > 1.7).astype(jnp.float32) + jnp.eye(n, dtype=jnp.float32)
    adj = a_bin / jnp.sum(a_bin, axis=1, keepdims=True)
    features = jax.random.normal(k_feat, (n, in_dim), dtype=jnp.float32)
    w1 = xavier_uniform(k_w1, in_dim, hidden_dim)
    w2 = xavier_uniform(k_w2, hidden_dim, hidden_dim)
    w3 = xavier_uniform(k_w3, hidden_dim, n_classes)
    return adj, features, w1, w2, w3


def _check_case(key, n, in_dim, hidden_dim, n_classes):
    adj, features, w1, w2, w3 = _make_case(key, n, in_dim, hidden_dim, n_classes)
    out = jax.block_until_ready(gcn_forward(adj, features, w1, w2, w3))
    ref = reference_forward(adj, features, w1, w2, w3)
    assert out.shape == (n, n_classes), out.shape
    max_err = float(jnp.max(jnp.abs(out - ref)))
    assert jnp.allclose(out, ref, atol=1e-4, rtol=1e-4), f"mismatch vs reference: {max_err}"


if __name__ == "__main__":
    key = jax.random.PRNGKey(0)
    k_small, k_mid = jax.random.split(key, 2)

    # Small synthetic graph: N=64 nodes, in_dim=32, hidden_dim=16, classes=8.
    _check_case(k_small, n=64, in_dim=32, hidden_dim=16, n_classes=8)

    # Non-128-divisible N and in_dim (exercises the padding + per-dim widths).
    _check_case(k_mid, n=300, in_dim=200, hidden_dim=16, n_classes=7)

    print("KERNEL_OK")
</pallas_src>

<mosaic_0001>
module attributes {stable_mosaic.version = 11 : i64} {
  func.func @_fused_gcn_kernel(%arg0: i32, %arg1: i32, %arg2: memref<128x128xf32, #tpu.memory_space<vmem>>, %arg3: memref<128x128xf32, #tpu.memory_space<vmem>>, %arg4: memref<128x128xf32, #tpu.memory_space<vmem>>, %arg5: memref<1x128x128xf32, #tpu.memory_space<vmem>>, %arg6: memref<128x128xf32, #tpu.memory_space<vmem>>, %arg7: memref<128x128xf32, #tpu.memory_space<vmem>>) attributes {dimension_semantics = [#tpu.dimension_semantics<arbitrary>, #tpu.dimension_semantics<arbitrary>], iteration_bounds = array<i64: 3, 1>, scalar_prefetch = 0 : i64, scratch_operands = 1 : i64, tpu.core_type = #tpu.core_type<tc>, window_params = [{transform_indices = @transform_0, window_bounds = array<i64: 128, 128>}, {transform_indices = @transform_1, window_bounds = array<i64: 128, 128>}, {pipeline_mode = #tpu.pipeline_mode<synchronous>, transform_indices = @transform_2, window_bounds = array<i64: 128, 128>}, {transform_indices = @transform_3, window_bounds = array<i64: 1, 128, 128>}, {pipeline_mode = #tpu.pipeline_mode<synchronous>, transform_indices = @transform_4, window_bounds = array<i64: 128, 128>}]} {
    %c128_i32 = arith.constant 128 : i32
    %0 = arith.muli %arg1, %c128_i32 : i32
    %1 = tpu.assume_multiple %0, 128 : i32
    %c0_i32 = arith.constant 0 : i32
    %2 = arith.cmpi eq, %arg1, %c0_i32 : i32
    %3 = arith.extui %2 : i1 to i32
    %c0_i32_0 = arith.constant 0 : i32
    %4 = arith.cmpi ne, %3, %c0_i32_0 : i32
    scf.if %4 {
      %cst = arith.constant 0.000000e+00 : f32
      %16 = vector.broadcast %cst : f32 to vector<128x128xf32>
      %c0 = arith.constant 0 : index
      %c0_7 = arith.constant 0 : index
      %17 = vector.load %arg6[%c0, %c0_7] : memref<128x128xf32, #tpu.memory_space<vmem>>, vector<128x128xf32>
      tpu.vector_store %arg6[%c0, %c0_7], %16 {strides = array<i32>} : memref<128x128xf32, #tpu.memory_space<vmem>>, vector<128x128xf32>,
    } else {
    }
    %c0_i32_1 = arith.constant 0 : i32
    %5 = arith.cmpi eq, %arg0, %c0_i32_1 : i32
    %6 = arith.extui %5 : i1 to i32
    %c0_i32_2 = arith.constant 0 : i32
    %7 = arith.cmpi ne, %6, %c0_i32_2 : i32
    scf.if %7 {
      %c0 = arith.constant 0 : index
      %c0_7 = arith.constant 0 : index
      %16 = vector.load %arg3[%c0, %c0_7] : memref<128x128xf32, #tpu.memory_space<vmem>>, vector<128x128xf32>
      %c0_8 = arith.constant 0 : index
      %c0_9 = arith.constant 0 : index
      %17 = vector.load %arg4[%c0_8, %c0_9] : memref<128x128xf32, #tpu.memory_space<vmem>>, vector<128x128xf32>
      %cst = arith.constant dense<0.000000e+00> : vector<128x128xf32>
      %18 = tpu.matmul %16, %17, %cst {dimension_numbers = #tpu.dot_dimension_numbers<[1], [0], [0], [1], [0, 0, 1, 1], [], []>} : vector<128x128xf32>, vector<128x128xf32>, vector<128x128xf32> -> vector<128x128xf32>
      %c0_10 = arith.constant 0 : index
      %c0_11 = arith.constant 0 : index
      %19 = vector.load %arg6[%c0_10, %c0_11] : memref<128x128xf32, #tpu.memory_space<vmem>>, vector<128x128xf32>
      %c0_12 = arith.constant 0 : index
      %c0_13 = arith.constant 0 : index
      %20 = vector.load %arg2[%c0_12, %c0_13] : memref<128x128xf32, #tpu.memory_space<vmem>>, vector<128x128xf32>
      %cst_14 = arith.constant dense<0.000000e+00> : vector<128x128xf32>
      %21 = tpu.matmul %20, %18, %cst_14 {dimension_numbers = #tpu.dot_dimension_numbers<[1], [0], [0], [1], [0, 0, 1, 1], [], []>} : vector<128x128xf32>, vector<128x128xf32>, vector<128x128xf32> -> vector<128x128xf32>
      %22 = arith.addf %19, %21 : vector<128x128xf32>
      %c0_15 = arith.constant 0 : index
      %c0_16 = arith.constant 0 : index
      %23 = vector.load %arg6[%c0_15, %c0_16] : memref<128x128xf32, #tpu.memory_space<vmem>>, vector<128x128xf32>
      tpu.vector_store %arg6[%c0_15, %c0_16], %22 {strides = array<i32>} : memref<128x128xf32, #tpu.memory_space<vmem>>, vector<128x128xf32>,
    } else {
    }
    %c0_i32_3 = arith.constant 0 : i32
    %8 = arith.cmpi sgt, %arg0, %c0_i32_3 : i32
    %9 = arith.extui %8 : i1 to i32
    %c0_i32_4 = arith.constant 0 : i32
    %10 = arith.cmpi ne, %9, %c0_i32_4 : i32
    scf.if %10 {
      %16 = arith.index_cast %1 : i32 to index
      %c0 = arith.constant 0 : index
      %17 = vector.load %arg7[%16, %c0] : memref<128x128xf32, #tpu.memory_space<vmem>>, vector<128x128xf32>
      %c0_7 = arith.constant 0 : index
      %c0_8 = arith.constant 0 : index
      %c0_9 = arith.constant 0 : index
      %18 = vector.load %arg5[%c0_7, %c0_8, %c0_9] : memref<1x128x128xf32, #tpu.memory_space<vmem>>, vector<1x128x128xf32>
      %19 = vector.shape_cast %18 : vector<1x128x128xf32> to vector<128x128xf32>
      %cst = arith.constant dense<0.000000e+00> : vector<128x128xf32>
      %20 = tpu.matmul %17, %19, %cst {dimension_numbers = #tpu.dot_dimension_numbers<[1], [0], [0], [1], [0, 0, 1, 1], [], []>} : vector<128x128xf32>, vector<128x128xf32>, vector<128x128xf32> -> vector<128x128xf32>
      %c0_10 = arith.constant 0 : index
      %c0_11 = arith.constant 0 : index
      %21 = vector.load %arg6[%c0_10, %c0_11] : memref<128x128xf32, #tpu.memory_space<vmem>>, vector<128x128xf32>
      %c0_12 = arith.constant 0 : index
      %c0_13 = arith.constant 0 : index
      %22 = vector.load %arg2[%c0_12, %c0_13] : memref<128x128xf32, #tpu.memory_space<vmem>>, vector<128x128xf32>
      %cst_14 = arith.constant dense<0.000000e+00> : vector<128x128xf32>
      %23 = tpu.matmul %22, %20, %cst_14 {dimension_numbers = #tpu.dot_dimension_numbers<[1], [0], [0], [1], [0, 0, 1, 1], [], []>} : vector<128x128xf32>, vector<128x128xf32>, vector<128x128xf32> -> vector<128x128xf32>
      %24 = arith.addf %21, %23 : vector<128x128xf32>
      %c0_15 = arith.constant 0 : index
      %c0_16 = arith.constant 0 : index
      %25 = vector.load %arg6[%c0_15, %c0_16] : memref<128x128xf32, #tpu.memory_space<vmem>>, vector<128x128xf32>
      tpu.vector_store %arg6[%c0_15, %c0_16], %24 {strides = array<i32>} : memref<128x128xf32, #tpu.memory_space<vmem>>, vector<128x128xf32>,
    } else {
    }
    %c0_i32_5 = arith.constant 0 : i32
    %11 = arith.cmpi eq, %arg1, %c0_i32_5 : i32
    %c2_i32 = arith.constant 2 : i32
    %12 = arith.cmpi slt, %arg0, %c2_i32 : i32
    %13 = arith.andi %11, %12 : i1
    %14 = arith.extui %13 : i1 to i32
    %c0_i32_6 = arith.constant 0 : i32
    %15 = arith.cmpi ne, %14, %c0_i32_6 : i32
    scf.if %15 {
      %c0 = arith.constant 0 : index
      %c0_7 = arith.constant 0 : index
      %16 = vector.load %arg6[%c0, %c0_7] : memref<128x128xf32, #tpu.memory_space<vmem>>, vector<128x128xf32>
      %cst = arith.constant 0.000000e+00 : f32
      %17 = vector.broadcast %cst : f32 to vector<128x128xf32>
      %18 = arith.maximumf %16, %17 : vector<128x128xf32>
      %c0_8 = arith.constant 0 : index
      %c0_9 = arith.constant 0 : index
      %19 = vector.load %arg7[%c0_8, %c0_9] : memref<128x128xf32, #tpu.memory_space<vmem>>, vector<128x128xf32>
      tpu.vector_store %arg7[%c0_8, %c0_9], %18 {strides = array<i32>} : memref<128x128xf32, #tpu.memory_space<vmem>>, vector<128x128xf32>,
    } else {
    }
    return
  }
  func.func @transform_0(%arg0: i32, %arg1: i32) -> (i32, i32) {
    %c0_i32 = arith.constant 0 : i32
    %c0_i32_0 = arith.constant 0 : i32
    return %c0_i32, %arg1 : i32, i32
  }
  func.func @transform_1(%arg0: i32, %arg1: i32) -> (i32, i32) {
    %c0_i32 = arith.constant 0 : i32
    %0 = arith.cmpi eq, %arg0, %c0_i32 : i32
    %c0_i32_0 = arith.constant 0 : i32
    %1 = arith.select %0, %arg1, %c0_i32_0 : i32
    %c0_i32_1 = arith.constant 0 : i32
    %c0_i32_2 = arith.constant 0 : i32
    return %1, %c0_i32_1 : i32, i32
  }
  func.func @transform_2(%arg0: i32, %arg1: i32) -> (i32, i32) {
    %c0_i32 = arith.constant 0 : i32
    %c0_i32_0 = arith.constant 0 : i32
    %c0_i32_1 = arith.constant 0 : i32
    return %c0_i32, %c0_i32_0 : i32, i32
  }
  func.func @transform_3(%arg0: i32, %arg1: i32) -> (i32, i32, i32) {
    %c1_i32 = arith.constant 1 : i32
    %0 = arith.subi %arg0, %c1_i32 : i32
    %c0_i32 = arith.constant 0 : i32
    %1 = arith.maxsi %0, %c0_i32 : i32
    %c0_i32_0 = arith.constant 0 : i32
    %c0_i32_1 = arith.constant 0 : i32
    %c0_i32_2 = arith.constant 0 : i32
    return %1, %c0_i32_0, %c0_i32_1 : i32, i32, i32
  }
  func.func @transform_4(%arg0: i32, %arg1: i32) -> (i32, i32) {
    %c0_i32 = arith.constant 0 : i32
    %c0_i32_0 = arith.constant 0 : i32
    %c0_i32_1 = arith.constant 0 : i32
    return %c0_i32, %c0_i32_0 : i32, i32
  }
}

</mosaic_0001>

<bundles_post_ra>
// kernel: gcn_forward.1
= control target key start
LH: loop header
LB: loop body
LE: loop exit
PB: predicated region body
PF: predicated region fallthrough
CT: control target
= control target key end

     0   :  { %s1642_s15 = smov 0   ;;  %s1644_s16 = smov 0   ;;  %s2178_s0 = inlined_call_operand.vmem [shape: f32[128,128], index: 0, kind: input, shape index: {}]   ;;  %s2179_s1 = inlined_call_operand.vmem [shape: f32[128,128], index: 1, kind: input, shape index: {}]   ;;  %s2180_s2 = inlined_call_operand.vmem [shape: f32[128,128], index: 2, kind: input, shape index: {}]   ;;  %s2181_s3 = inlined_call_operand.vmem [shape: f32[2,128,128], index: 3, kind: input, shape index: {}]   ;;  %s2182_s4 = inlined_call_operand.vmem [shape: f32[128,128], index: 4, kind: output, shape index: {}]  }
   0x1   :  { %s1646_s17 = smov 0  }
   0x2 LB: > { %s26_s18 = sadd.s32 1, %s1610_s16  ;;  %p1197_p0 = scmp.ge.s32.totalorder %s1614_s17, 1  ;;  %s1614_s17 = sphi %s1646_s17, %s14_s17   ;;  %s1610_s16 = sphi %s1644_s16, %s2184_s16   ;;  %s1606_s15 = sphi %s1642_s15, %s2183_s15  }
   0x3   : > { %p28_p1 = scmp.ge.s32.totalorder %s26_s18, 3  ;;  %p209_p2 = scmp.lt.s32.totalorder %s1614_s17, 4 }
   0x5   : > { %s2186_s18 = smov (%p28_p1, %s26_s18), 0  ;;  %p210_p3 = pnand %p1197_p0, %p209_p2 }
   0x6   : > { %s1198_s19 = sadd.s32 (!%p210_p3), 4294967295, %s1606_s15  ;;  %p1206_p6 = scmp.ne.s32.totalorder (!%p210_p3), %s1606_s15, 0 }
   0x7   : > { %213 = sbr.rel (%p210_p3) target bundleno = 1065 (0x429), region = 36  ;;  %p259_p4 = scmp.gt.s32.totalorder (!%p210_p3), %s1198_s19, 0 }
   0x8   : > { %p1199_p5 = scmp.lt.s32.totalorder (!%p210_p3), %s1198_s19, 1 }
   0xc   : > { %v1616_v0 = vmov 0.0   ;;  %s260_s5 = scalar_select %p259_p4, %s1198_s19, 0 }
   0xd   : > { %274 = vst [vmem:[%s2182_s4] sm:$0xff] %v1616_v0  ;;  %275 = vst [vmem:[%s2182_s4 + $0x8] sm:$0xff] %v1616_v0 }
   0xe   : > { %276 = vst [vmem:[%s2182_s4 + $0x10] sm:$0xff] %v1616_v0  ;;  %277 = vst [vmem:[%s2182_s4 + $0x18] sm:$0xff] %v1616_v0  ;;  %s2188_s5 = smov (!%p1199_p5, %s260_s5), 1 }
   0xf   : > { %278 = vst [vmem:[%s2182_s4 + $0x20] sm:$0xff] %v1616_v0  ;;  %279 = vst [vmem:[%s2182_s4 + $0x28] sm:$0xff] %v1616_v0  ;;  %s1213_s6 = sshll.u32 %s2188_s5, 7 }
  0x10   : > { %280 = vst [vmem:[%s2182_s4 + $0x30] sm:$0xff] %v1616_v0  ;;  %281 = vst [vmem:[%s2182_s4 + $0x38] sm:$0xff] %v1616_v0  ;;  %s1716_s9 = scalar_lea.vmem %s2181_s3, %s1213_s6  ;;  %293 = sbr.rel (%p1206_p6) target bundleno = 533 (0x215), region = 44 }
  0x11   : > { %282 = vst [vmem:[%s2182_s4 + $0x40] sm:$0xff] %v1616_v0  ;;  %283 = vst [vmem:[%s2182_s4 + $0x48] sm:$0xff] %v1616_v0 }
  0x12   : > { %284 = vst [vmem:[%s2182_s4 + $0x50] sm:$0xff] %v1616_v0  ;;  %285 = vst [vmem:[%s2182_s4 + $0x58] sm:$0xff] %v1616_v0 }
  0x13   : > { %286 = vst [vmem:[%s2182_s4 + $0x60] sm:$0xff] %v1616_v0  ;;  %287 = vst [vmem:[%s2182_s4 + $0x68] sm:$0xff] %v1616_v0 }
  0x14   : > { %288 = vst [vmem:[%s2182_s4 + $0x70] sm:$0xff] %v1616_v0  ;;  %289 = vst [vmem:[%s2182_s4 + $0x78] sm:$0xff] %v1616_v0 }
  0x15   : > { %v325_v1 = vld [vmem:[%s2180_s2 + $0x78] sm:$0xff]  ;;  %v324_v2 = vld [vmem:[%s2180_s2 + $0x70] sm:$0xff]  ;;  %v323_v3 = vld [vmem:[%s2180_s2 + $0x68] sm:$0xff] }
  0x16   : > { %1343 = vmatprep.subr.mxu0 %v325_v1  ;;  %v322_v4 = vld [vmem:[%s2180_s2 + $0x60] sm:$0xff]  ;;  %v321_v6 = vld [vmem:[%s2180_s2 + $0x58] sm:$0xff]  ;;  %v320_v7 = vld [vmem:[%s2180_s2 + $0x50] sm:$0xff] }
  0x17   : > { %1344 = vmatpush3.msra.mxu0 %v325_v1  ;;  %v294_v5 = vld [vmem:[%s2179_s1] sm:$0xff]  ;;  %v319_v8 = vld [vmem:[%s2180_s2 + $0x48] sm:$0xff]  ;;  %v317_v10 = vld [vmem:[%s2180_s2 + $0x38] sm:$0xff] }
  0x18   : > { %1345 = vmatprep.subr.mxu0 %v324_v2  ;;  %1375 = vmatprep.mubr.f32.mxu0 %v294_v5  ;;  %v318_v9 = vld [vmem:[%s2180_s2 + $0x40] sm:$0xff]  ;;  %v316_v11 = vld [vmem:[%s2180_s2 + $0x30] sm:$0xff]  ;;  %v315_v12 = vld [vmem:[%s2180_s2 + $0x28] sm:$0xff] }
  0x19   : > { %1346 = vmatpush3.msra.mxu0 %v324_v2  ;;  %v314_v13 = vld [vmem:[%s2180_s2 + $0x20] sm:$0xff]  ;;  %v313_v14 = vld [vmem:[%s2180_s2 + $0x18] sm:$0xff]  ;;  %v312_v15 = vld [vmem:[%s2180_s2 + $0x10] sm:$0xff] }
  0x1a   : > { %1347 = vmatprep.subr.mxu0 %v323_v3  ;;  %v311_v16 = vld [vmem:[%s2180_s2 + $0x8] sm:$0xff]  ;;  %v310_v17 = vld [vmem:[%s2180_s2] sm:$0xff]  ;;  %v296_v19 = vld [vmem:[%s2179_s1 + $0x10] sm:$0xff] }
  0x1b   : > { %1348 = vmatpush3.msra.mxu0 %v323_v3  ;;  %v295_v18 = vld [vmem:[%s2179_s1 + $0x8] sm:$0xff]  ;;  %v297_v20 = vld [vmem:[%s2179_s1 + $0x18] sm:$0xff]  ;;  %v298_v21 = vld [vmem:[%s2179_s1 + $0x20] sm:$0xff] }
  0x1c   : > { %1349 = vmatprep.subr.mxu0 %v322_v4  ;;  %v299_v22 = vld [vmem:[%s2179_s1 + $0x28] sm:$0xff]  ;;  %v300_v23 = vld [vmem:[%s2179_s1 + $0x30] sm:$0xff]  ;;  %v301_v24 = vld [vmem:[%s2179_s1 + $0x38] sm:$0xff] }
  0x1d   : > { %1350 = vmatpush3.msra.mxu0 %v322_v4  ;;  %v302_v25 = vld [vmem:[%s2179_s1 + $0x40] sm:$0xff]  ;;  %v303_v26 = vld [vmem:[%s2179_s1 + $0x48] sm:$0xff]  ;;  %v304_v27 = vld [vmem:[%s2179_s1 + $0x50] sm:$0xff] }
  0x1e   : > { %1351 = vmatprep.subr.mxu0 %v321_v6  ;;  %v305_v28 = vld [vmem:[%s2179_s1 + $0x58] sm:$0xff]  ;;  %v306_v29 = vld [vmem:[%s2179_s1 + $0x60] sm:$0xff]  ;;  %v307_v30 = vld [vmem:[%s2179_s1 + $0x68] sm:$0xff] }
  0x1f   : > { %1352 = vmatpush3.msra.mxu0 %v321_v6  ;;  %v308_v31 = vld [vmem:[%s2179_s1 + $0x70] sm:$0xff]  ;;  %v309_v32 = vld [vmem:[%s2179_s1 + $0x78] sm:$0xff]  ;;  %v487_v33 = vld [vmem:[%s2178_s0] sm:$0xff] }
  0x20   : > { %1353 = vmatprep.subr.mxu0 %v320_v7  ;;  %1431 = vmatprep.mubr.f32.mxu1 %v487_v33  ;;  %v488_v50 = vld [vmem:[%s2178_s0 + $0x8] sm:$0xff]  ;;  %v489_v51 = vld [vmem:[%s2178_s0 + $0x10] sm:$0xff]  ;;  %v490_v52 = vld [vmem:[%s2178_s0 + $0x18] sm:$0xff] }
  0x21   : > { %1354 = vmatpush3.msra.mxu0 %v320_v7  ;;  %v491_v53 = vld [vmem:[%s2178_s0 + $0x20] sm:$0xff]  ;;  %v492_v54 = vld [vmem:[%s2178_s0 + $0x28] sm:$0xff]  ;;  %v493_v55 = vld [vmem:[%s2178_s0 + $0x30] sm:$0xff] }
  0x22   : > { %1355 = vmatprep.subr.mxu0 %v319_v8  ;;  %v494_v56 = vld [vmem:[%s2178_s0 + $0x38] sm:$0xff]  ;;  %v495_v57 = vld [vmem:[%s2178_s0 + $0x40] sm:$0xff]  ;;  %v496_v58 = vld [vmem:[%s2178_s0 + $0x48] sm:$0xff] }
  0x23   : > { %1356 = vmatpush3.msra.mxu0 %v319_v8  ;;  %v497_v59 = vld [vmem:[%s2178_s0 + $0x50] sm:$0xff]  ;;  %v498_v60 = vld [vmem:[%s2178_s0 + $0x58] sm:$0xff]  ;;  %v499_v61 = vld [vmem:[%s2178_s0 + $0x60] sm:$0xff] }
  0x24   : > { %1357 = vmatprep.subr.mxu0 %v318_v9  ;;  %v500_v62 = vld [vmem:[%s2178_s0 + $0x68] sm:$0xff]  ;;  %v501_v63 = vld [vmem:[%s2178_s0 + $0x70] sm:$0xff]  ;;  %v502_v0 = vld [vmem:[%s2178_s0 + $0x78] sm:$0xff] }
  0x25   : > { %1358 = vmatpush3.msra.mxu0 %v318_v9  ;;  %v472_v1 = vld [vmem:[%s2182_s4 + $0x8] sm:$0xff]  ;;  %v471_v3 = vld [vmem:[%s2182_s4] sm:$0xff]  ;;  %v474_v6 = vld [vmem:[%s2182_s4 + $0x18] sm:$0xff] }
  0x26   : > { %1359 = vmatprep.subr.mxu0 %v317_v10  ;;  %v473_v9 = vld [vmem:[%s2182_s4 + $0x10] sm:$0xff] }
  0x27   : > { %1360 = vmatpush3.msra.mxu0 %v317_v10  ;;  %v481_v33 = vld [vmem:[%s2182_s4 + $0x50] sm:$0xff] }
  0x28   : > { %1361 = vmatprep.subr.mxu0 %v316_v11 }
  0x29   : > { %1362 = vmatpush3.msra.mxu0 %v316_v11 }
  0x2a   : > { %1363 = vmatprep.subr.mxu0 %v315_v12 }
  0x2b   : > { %1364 = vmatpush3.msra.mxu0 %v315_v12  ;;  %v476_v12 = vld [vmem:[%s2182_s4 + $0x28] sm:$0xff] }
  0x2c   : > { %1365 = vmatprep.subr.mxu0 %v314_v13 }
  0x2d   : > { %1366 = vmatpush3.msra.mxu0 %v314_v13 }
  0x2e   : > { %1367 = vmatprep.subr.mxu0 %v313_v14 }
  0x2f   : > { %1368 = vmatpush3.msra.mxu0 %v313_v14 }
  0x30   : > { %1369 = vmatprep.subr.mxu0 %v312_v15 }
  0x31   : > { %1370 = vmatpush3.msra.mxu0 %v312_v15  ;;  %v475_v15 = vld [vmem:[%s2182_s4 + $0x20] sm:$0xff] }
  0x32   : > { %1371 = vmatprep.subr.mxu0 %v311_v16 }
  0x33   : > { %1372 = vmatpush3.msra.mxu0 %v311_v16 }
  0x34   : > { %1373 = vmatprep.subr.mxu0 %v310_v17 }
  0x35   : > { %1374 = vmatpush3.msra.mxu0 %v310_v17 }
  0x36   : > { %1376 = vmatmul.mubr.f32.vlgmr.msra.gmra.mxu0 %v295_v18  ;;  %v478_v18 = vld [vmem:[%s2182_s4 + $0x38] sm:$0xff] }
  0x37   : > { %1378 = vmatprep.mubr.f32.mxu0 %v296_v19 }
  0x3a   : > { %1379 = vmatmul.mubr.f32.gmra.mxu0 %v297_v20 }
  0x3b   : > { %1381 = vmatprep.mubr.f32.mxu0 %v298_v21  ;;  %v477_v21 = vld [vmem:[%s2182_s4 + $0x30] sm:$0xff] }
  0x3e   : > { %1382 = vmatmul.mubr.f32.gmra.mxu0 %v299_v22 }
  0x3f   : > { %1384 = vmatprep.mubr.f32.mxu0 %v300_v23 }
  0x42   : > { %1385 = vmatmul.mubr.f32.gmra.mxu0 %v301_v24  ;;  %v480_v24 = vld [vmem:[%s2182_s4 + $0x48] sm:$0xff] }
  0x43   : > { %1387 = vmatprep.mubr.f32.mxu0 %v302_v25 }
  0x46   : > { %1388 = vmatmul.mubr.f32.gmra.mxu0 %v303_v26 }
  0x47   : > { %1390 = vmatprep.mubr.f32.mxu0 %v304_v27  ;;  %v479_v27 = vld [vmem:[%s2182_s4 + $0x40] sm:$0xff] }
  0x4a   : > { %1391 = vmatmul.mubr.f32.gmra.mxu0 %v305_v28 }
  0x4b   : > { %1393 = vmatprep.mubr.f32.mxu0 %v306_v29 }
  0x4e   : > { %1394 = vmatmul.mubr.f32.gmra.mxu0 %v307_v30  ;;  %v482_v30 = vld [vmem:[%s2182_s4 + $0x58] sm:$0xff] }
  0x4f   : > { %1396 = vmatprep.mubr.f32.mxu0 %v308_v31 }
  0x52   : > { %1397 = vmatmul.mubr.f32.gmra.mxu0 %v309_v32 }
  0xf6   : > { %v1377_v34 = vpop.f32.mrf.mxu0 }
  0xf8   : > { %v392_v35 = vpop.f32.mrf.mxu0 }
  0xfa   : > { %v1380_v36 = vpop.f32.mrf.mxu0 }
  0xfc   : > { %v402_v37 = vpop.f32.mrf.mxu0 }
  0xfe   : > { %v1383_v38 = vpop.f32.mrf.mxu0 }
 0x100   : > { %v412_v39 = vpop.f32.mrf.mxu0 }
 0x102   : > { %v1386_v40 = vpop.f32.mrf.mxu0 }
 0x104   : > { %v422_v41 = vpop.f32.mrf.mxu0 }
 0x106   : > { %v1389_v42 = vpop.f32.mrf.mxu0 }
 0x108   : > { %v432_v43 = vpop.f32.mrf.mxu0 }
 0x10a   : > { %v1392_v44 = vpop.f32.mrf.mxu0 }
 0x10c   : > { %v442_v45 = vpop.f32.mrf.mxu0 }
 0x10e   : > { %v1395_v46 = vpop.f32.mrf.mxu0 }
 0x110   : > { %v452_v47 = vpop.f32.mrf.mxu0 }
 0x112   : > { %v1398_v48 = vpop.f32.mrf.mxu0 }
 0x113   : > { %1399 = vmatprep.subr.mxu1 %v1398_v48 }
 0x114   : > { %v462_v49 = vpop.f32.mrf.mxu0  ;;  %1400 = vmatpush3.msra.mxu1 %v1398_v48 }
 0x115   : > { %1401 = vmatprep.subr.mxu1 %v462_v49 }
 0x116   : > { %1402 = vmatpush3.msra.mxu1 %v462_v49 }
 0x117   : > { %1403 = vmatprep.subr.mxu1 %v1395_v46 }
 0x118   : > { %1404 = vmatpush3.msra.mxu1 %v1395_v46 }
 0x119   : > { %1405 = vmatprep.subr.mxu1 %v452_v47 }
 0x11a   : > { %1406 = vmatpush3.msra.mxu1 %v452_v47 }
 0x11b   : > { %1407 = vmatprep.subr.mxu1 %v1392_v44 }
 0x11c   : > { %1408 = vmatpush3.msra.mxu1 %v1392_v44 }
 0x11d   : > { %1409 = vmatprep.subr.mxu1 %v442_v45 }
 0x11e   : > { %1410 = vmatpush3.msra.mxu1 %v442_v45  ;;  %v485_v45 = vld [vmem:[%s2182_s4 + $0x70] sm:$0xff] }
 0x11f   : > { %1411 = vmatprep.subr.mxu1 %v1389_v42 }
 0x120   : > { %1412 = vmatpush3.msra.mxu1 %v1389_v42  ;;  %v486_v42 = vld [vmem:[%s2182_s4 + $0x78] sm:$0xff] }
 0x121   : > { %1413 = vmatprep.subr.mxu1 %v432_v43 }
 0x122   : > { %1414 = vmatpush3.msra.mxu1 %v432_v43 }
 0x123   : > { %1415 = vmatprep.subr.mxu1 %v1386_v40 }
 0x124   : > { %1416 = vmatpush3.msra.mxu1 %v1386_v40 }
 0x125   : > { %1417 = vmatprep.subr.mxu1 %v422_v41 }
 0x126   : > { %1418 = vmatpush3.msra.mxu1 %v422_v41 }
 0x127   : > { %1419 = vmatprep.subr.mxu1 %v1383_v38 }
 0x128   : > { %1420 = vmatpush3.msra.mxu1 %v1383_v38 }
 0x129   : > { %1421 = vmatprep.subr.mxu1 %v412_v39 }
 0x12a   : > { %1422 = vmatpush3.msra.mxu1 %v412_v39  ;;  %v483_v39 = vld [vmem:[%s2182_s4 + $0x60] sm:$0xff] }
 0x12b   : > { %1423 = vmatprep.subr.mxu1 %v1380_v36 }
 0x12c   : > { %1424 = vmatpush3.msra.mxu1 %v1380_v36  ;;  %v484_v36 = vld [vmem:[%s2182_s4 + $0x68] sm:$0xff] }
 0x12d   : > { %1425 = vmatprep.subr.mxu1 %v402_v37 }
 0x12e   : > { %1426 = vmatpush3.msra.mxu1 %v402_v37 }
 0x12f   : > { %1427 = vmatprep.subr.mxu1 %v1377_v34 }
 0x130   : > { %1428 = vmatpush3.msra.mxu1 %v1377_v34 }
 0x131   : > { %1429 = vmatprep.subr.mxu1 %v392_v35 }
 0x132   : > { %1430 = vmatpush3.msra.mxu1 %v392_v35 }
 0x133   : > { %1432 = vmatmul.mubr.f32.vlgmr.msra.gmra.mxu1 %v488_v50 }
 0x134   : > { %1434 = vmatprep.mubr.f32.mxu1 %v489_v51 }
 0x137   : > { %1435 = vmatmul.mubr.f32.gmra.mxu1 %v490_v52 }
 0x138   : > { %1437 = vmatprep.mubr.f32.mxu1 %v491_v53 }
 0x13b   : > { %1438 = vmatmul.mubr.f32.gmra.mxu1 %v492_v54 }
 0x13c   : > { %1440 = vmatprep.mubr.f32.mxu1 %v493_v55 }
 0x13f   : > { %1441 = vmatmul.mubr.f32.gmra.mxu1 %v494_v56 }
 0x140   : > { %1443 = vmatprep.mubr.f32.mxu1 %v495_v57 }
 0x143   : > { %1444 = vmatmul.mubr.f32.gmra.mxu1 %v496_v58 }
 0x144   : > { %1446 = vmatprep.mubr.f32.mxu1 %v497_v59 }
 0x147   : > { %1447 = vmatmul.mubr.f32.gmra.mxu1 %v498_v60 }
 0x148   : > { %1449 = vmatprep.mubr.f32.mxu1 %v499_v61 }
 0x14b   : > { %1450 = vmatmul.mubr.f32.gmra.mxu1 %v500_v62 }
 0x14c   : > { %1452 = vmatprep.mubr.f32.mxu1 %v501_v63 }
 0x14f   : > { %1453 = vmatmul.mubr.f32.gmra.mxu1 %v502_v0 }
 0x1f3   : > { %v1433_v2 = vpop.f32.mrf.mxu1 }
 0x1f4   : > { %v649_v4 = vadd.f32 %v1433_v2, %v472_v1 }
 0x1f5   : > { %v569_v5 = vpop.f32.mrf.mxu1 }
 0x1f6   : > { %665 = vst [vmem:[%s2182_s4 + $0x8] sm:$0xff] %v649_v4  ;;  %v648_v7 = vadd.f32 %v569_v5, %v471_v3 }
 0x1f7   : > { %v1436_v8 = vpop.f32.mrf.mxu1 }
 0x1f8   : > { %664 = vst [vmem:[%s2182_s4] sm:$0xff] %v648_v7  ;;  %v651_v10 = vadd.f32 %v1436_v8, %v474_v6 }
 0x1f9   : > { %v579_v11 = vpop.f32.mrf.mxu1 }
 0x1fa   : > { %667 = vst [vmem:[%s2182_s4 + $0x18] sm:$0xff] %v651_v10  ;;  %v650_v13 = vadd.f32 %v579_v11, %v473_v9 }
 0x1fb   : > { %v1439_v14 = vpop.f32.mrf.mxu1 }
 0x1fc   : > { %666 = vst [vmem:[%s2182_s4 + $0x10] sm:$0xff] %v650_v13  ;;  %v653_v16 = vadd.f32 %v1439_v14, %v476_v12 }
 0x1fd   : > { %v589_v17 = vpop.f32.mrf.mxu1 }
 0x1fe   : > { %669 = vst [vmem:[%s2182_s4 + $0x28] sm:$0xff] %v653_v16  ;;  %v652_v19 = vadd.f32 %v589_v17, %v475_v15 }
 0x1ff   : > { %v1442_v20 = vpop.f32.mrf.mxu1 }
 0x200   : > { %668 = vst [vmem:[%s2182_s4 + $0x20] sm:$0xff] %v652_v19  ;;  %v655_v22 = vadd.f32 %v1442_v20, %v478_v18 }
 0x201   : > { %v599_v23 = vpop.f32.mrf.mxu1 }
 0x202   : > { %671 = vst [vmem:[%s2182_s4 + $0x38] sm:$0xff] %v655_v22  ;;  %v654_v25 = vadd.f32 %v599_v23, %v477_v21 }
 0x203   : > { %v1445_v26 = vpop.f32.mrf.mxu1 }
 0x204   : > { %670 = vst [vmem:[%s2182_s4 + $0x30] sm:$0xff] %v654_v25  ;;  %v657_v28 = vadd.f32 %v1445_v26, %v480_v24 }
 0x205   : > { %v609_v29 = vpop.f32.mrf.mxu1 }
 0x206   : > { %673 = vst [vmem:[%s2182_s4 + $0x48] sm:$0xff] %v657_v28  ;;  %v656_v31 = vadd.f32 %v609_v29, %v479_v27 }
 0x207   : > { %v1448_v32 = vpop.f32.mrf.mxu1 }
 0x208   : > { %672 = vst [vmem:[%s2182_s4 + $0x40] sm:$0xff] %v656_v31  ;;  %v659_v34 = vadd.f32 %v1448_v32, %v482_v30 }
 0x209   : > { %v619_v35 = vpop.f32.mrf.mxu1 }
 0x20a   : > { %675 = vst [vmem:[%s2182_s4 + $0x58] sm:$0xff] %v659_v34  ;;  %v658_v37 = vadd.f32 %v619_v35, %v481_v33 }
 0x20b   : > { %v1451_v38 = vpop.f32.mrf.mxu1 }
 0x20c   : > { %674 = vst [vmem:[%s2182_s4 + $0x50] sm:$0xff] %v658_v37  ;;  %v661_v40 = vadd.f32 %v1451_v38, %v484_v36 }
 0x20d   : > { %v629_v41 = vpop.f32.mrf.mxu1 }
 0x20e   : > { %677 = vst [vmem:[%s2182_s4 + $0x68] sm:$0xff] %v661_v40  ;;  %v660_v43 = vadd.f32 %v629_v41, %v483_v39 }
 0x20f   : > { %v1454_v44 = vpop.f32.mrf.mxu1 }
 0x210   : > { %676 = vst [vmem:[%s2182_s4 + $0x60] sm:$0xff] %v660_v43  ;;  %v663_v46 = vadd.f32 %v1454_v44, %v486_v42 }
 0x211   : > { %v639_v47 = vpop.f32.mrf.mxu1 }
 0x212   : > { %679 = vst [vmem:[%s2182_s4 + $0x78] sm:$0xff] %v663_v46  ;;  %v662_v48 = vadd.f32 %v639_v47, %v485_v45 }
 0x214   : > { %678 = vst [vmem:[%s2182_s4 + $0x70] sm:$0xff] %v662_v48 }
 0x215 PF: > { %p1207_p7 = scmp.le.s32.totalorder %s1606_s15, 0 }
 0x217   : > { %683 = sbr.rel (%p1207_p7) target bundleno = 1052 (0x41c), region = 48 }
 0x21c   : > { %v716_v49 = vld [vmem:[%s1716_s9 + $0x78] sm:$0xff]  ;;  %v715_v50 = vld [vmem:[%s1716_s9 + $0x70] sm:$0xff]  ;;  %v714_v51 = vld [vmem:[%s1716_s9 + $0x68] sm:$0xff] }
 0x21d   : > { %1455 = vmatprep.subr.mxu0 %v716_v49  ;;  %v713_v52 = vld [vmem:[%s1716_s9 + $0x60] sm:$0xff]  ;;  %v685_v53 = vld [vmem:[#allocation2 + $0x30] sm:$0xff]  ;;  %v712_v54 = vld [vmem:[%s1716_s9 + $0x58] sm:$0xff] }
 0x21e   : > { %1456 = vmatpush3.msra.mxu0 %v716_v49  ;;  %1487 = vmatprep.mubr.f32.mxu0 %v685_v53  ;;  %v711_v55 = vld [vmem:[%s1716_s9 + $0x50] sm:$0xff]  ;;  %v710_v56 = vld [vmem:[%s1716_s9 + $0x48] sm:$0xff]  ;;  %v709_v57 = vld [vmem:[%s1716_s9 + $0x40] sm:$0xff] }
 0x21f   : > { %1457 = vmatprep.subr.mxu0 %v715_v50  ;;  %v708_v58 = vld [vmem:[%s1716_s9 + $0x38] sm:$0xff]  ;;  %v707_v59 = vld [vmem:[%s1716_s9 + $0x30] sm:$0xff]  ;;  %v706_v60 = vld [vmem:[%s1716_s9 + $0x28] sm:$0xff] }
 0x220   : > { %1458 = vmatpush3.msra.mxu0 %v715_v50  ;;  %v705_v61 = vld [vmem:[%s1716_s9 + $0x20] sm:$0xff]  ;;  %v704_v62 = vld [vmem:[%s1716_s9 + $0x18] sm:$0xff]  ;;  %v703_v63 = vld [vmem:[%s1716_s9 + $0x10] sm:$0xff] }
 0x221   : > { %1459 = vmatprep.subr.mxu0 %v714_v51  ;;  %v702_v0 = vld [vmem:[%s1716_s9 + $0x8] sm:$0xff]  ;;  %v701_v1 = vld [vmem:[%s1716_s9] sm:$0xff]  ;;  %v687_v3 = vld [vmem:[#allocation2 + $0x58] sm:$0xff] }
 0x222   : > { %1460 = vmatpush3.msra.mxu0 %v714_v51  ;;  %v686_v2 = vld [vmem:[#allocation2] sm:$0xff]  ;;  %v688_v4 = vld [vmem:[#allocation2 + $0x18] sm:$0xff]  ;;  %v689_v5 = vld [vmem:[#allocation2 + $0x50] sm:$0xff] }
 0x223   : > { %1461 = vmatprep.subr.mxu0 %v713_v52  ;;  %v690_v6 = vld [vmem:[#allocation2 + $0x68] sm:$0xff]  ;;  %v693_v9 = vld [vmem:[#allocation2 + $0x40] sm:$0xff]  ;;  %v695_v11 = vld [vmem:[#allocation2 + $0x10] sm:$0xff] }
 0x224   : > { %1462 = vmatpush3.msra.mxu0 %v713_v52  ;;  %v691_v7 = vld [vmem:[#allocation2 + $0x8] sm:$0xff]  ;;  %v694_v10 = vld [vmem:[#allocation2 + $0x20] sm:$0xff]  ;;  %v696_v12 = vld [vmem:[#allocation2 + $0x38] sm:$0xff] }
 0x225   : > { %1463 = vmatprep.subr.mxu0 %v712_v54  ;;  %v692_v8 = vld [vmem:[#allocation2 + $0x48] sm:$0xff]  ;;  %v697_v13 = vld [vmem:[#allocation2 + $0x60] sm:$0xff]  ;;  %v698_v14 = vld [vmem:[#allocation2 + $0x70] sm:$0xff] }
 0x226   : > { %1464 = vmatpush3.msra.mxu0 %v712_v54  ;;  %v699_v15 = vld [vmem:[#allocation2 + $0x78] sm:$0xff]  ;;  %v700_v16 = vld [vmem:[#allocation2 + $0x28] sm:$0xff]  ;;  %v878_v17 = vld [vmem:[%s2178_s0] sm:$0xff] }
 0x227   : > { %1465 = vmatprep.subr.mxu0 %v711_v55  ;;  %1543 = vmatprep.mubr.f32.mxu1 %v878_v17  ;;  %v879_v34 = vld [vmem:[%s2178_s0 + $0x8] sm:$0xff]  ;;  %v880_v35 = vld [vmem:[%s2178_s0 + $0x10] sm:$0xff]  ;;  %v881_v36 = vld [vmem:[%s2178_s0 + $0x18] sm:$0xff] }
 0x228   : > { %1466 = vmatpush3.msra.mxu0 %v711_v55  ;;  %v882_v37 = vld [vmem:[%s2178_s0 + $0x20] sm:$0xff]  ;;  %v883_v38 = vld [vmem:[%s2178_s0 + $0x28] sm:$0xff]  ;;  %v884_v39 = vld [vmem:[%s2178_s0 + $0x30] sm:$0xff] }
 0x229   : > { %1467 = vmatprep.subr.mxu0 %v710_v56  ;;  %v885_v40 = vld [vmem:[%s2178_s0 + $0x38] sm:$0xff]  ;;  %v886_v41 = vld [vmem:[%s2178_s0 + $0x40] sm:$0xff]  ;;  %v887_v42 = vld [vmem:[%s2178_s0 + $0x48] sm:$0xff] }
 0x22a   : > { %1468 = vmatpush3.msra.mxu0 %v710_v56  ;;  %v888_v43 = vld [vmem:[%s2178_s0 + $0x50] sm:$0xff]  ;;  %v889_v44 = vld [vmem:[%s2178_s0 + $0x58] sm:$0xff]  ;;  %v890_v45 = vld [vmem:[%s2178_s0 + $0x60] sm:$0xff] }
 0x22b   : > { %1469 = vmatprep.subr.mxu0 %v709_v57  ;;  %v891_v46 = vld [vmem:[%s2178_s0 + $0x68] sm:$0xff]  ;;  %v892_v47 = vld [vmem:[%s2178_s0 + $0x70] sm:$0xff]  ;;  %v893_v48 = vld [vmem:[%s2178_s0 + $0x78] sm:$0xff] }
 0x22c   : > { %1470 = vmatpush3.msra.mxu0 %v709_v57  ;;  %v863_v49 = vld [vmem:[%s2182_s4 + $0x8] sm:$0xff]  ;;  %v862_v51 = vld [vmem:[%s2182_s4] sm:$0xff]  ;;  %v865_v54 = vld [vmem:[%s2182_s4 + $0x18] sm:$0xff] }
 0x22d   : > { %1471 = vmatprep.subr.mxu0 %v708_v58  ;;  %v864_v57 = vld [vmem:[%s2182_s4 + $0x10] sm:$0xff] }
 0x22e   : > { %1472 = vmatpush3.msra.mxu0 %v708_v58  ;;  %v872_v17 = vld [vmem:[%s2182_s4 + $0x50] sm:$0xff] }
 0x22f   : > { %1473 = vmatprep.subr.mxu0 %v707_v59 }
 0x230   : > { %1474 = vmatpush3.msra.mxu0 %v707_v59 }
 0x231   : > { %1475 = vmatprep.subr.mxu0 %v706_v60 }
 0x232   : > { %1476 = vmatpush3.msra.mxu0 %v706_v60  ;;  %v867_v60 = vld [vmem:[%s2182_s4 + $0x28] sm:$0xff] }
 0x233   : > { %1477 = vmatprep.subr.mxu0 %v705_v61 }
 0x234   : > { %1478 = vmatpush3.msra.mxu0 %v705_v61 }
 0x235   : > { %1479 = vmatprep.subr.mxu0 %v704_v62 }
 0x236   : > { %1480 = vmatpush3.msra.mxu0 %v704_v62 }
 0x237   : > { %1481 = vmatprep.subr.mxu0 %v703_v63 }
 0x238   : > { %1482 = vmatpush3.msra.mxu0 %v703_v63  ;;  %v866_v63 = vld [vmem:[%s2182_s4 + $0x20] sm:$0xff] }
 0x239   : > { %1483 = vmatprep.subr.mxu0 %v702_v0 }
 0x23a   : > { %1484 = vmatpush3.msra.mxu0 %v702_v0 }
 0x23b   : > { %1485 = vmatprep.subr.mxu0 %v701_v1 }
 0x23c   : > { %1486 = vmatpush3.msra.mxu0 %v701_v1 }
 0x23d   : > { %1488 = vmatmul.mubr.f32.vlgmr.msra.gmra.mxu0 %v686_v2  ;;  %v869_v2 = vld [vmem:[%s2182_s4 + $0x38] sm:$0xff] }
 0x23e   : > { %1490 = vmatprep.mubr.f32.mxu0 %v687_v3 }
 0x241   : > { %1491 = vmatmul.mubr.f32.gmra.mxu0 %v688_v4 }
 0x242   : > { %1493 = vmatprep.mubr.f32.mxu0 %v689_v5  ;;  %v868_v5 = vld [vmem:[%s2182_s4 + $0x30] sm:$0xff] }
 0x245   : > { %1494 = vmatmul.mubr.f32.gmra.mxu0 %v690_v6 }
 0x246   : > { %1496 = vmatprep.mubr.f32.mxu0 %v691_v7 }
 0x249   : > { %1497 = vmatmul.mubr.f32.gmra.mxu0 %v692_v8  ;;  %v871_v8 = vld [vmem:[%s2182_s4 + $0x48] sm:$0xff] }
 0x24a   : > { %1499 = vmatprep.mubr.f32.mxu0 %v693_v9 }
 0x24d   : > { %1500 = vmatmul.mubr.f32.gmra.mxu0 %v694_v10 }
 0x24e   : > { %1502 = vmatprep.mubr.f32.mxu0 %v695_v11  ;;  %v870_v11 = vld [vmem:[%s2182_s4 + $0x40] sm:$0xff] }
 0x251   : > { %1503 = vmatmul.mubr.f32.gmra.mxu0 %v696_v12 }
 0x252   : > { %1505 = vmatprep.mubr.f32.mxu0 %v697_v13 }
 0x255   : > { %1506 = vmatmul.mubr.f32.gmra.mxu0 %v698_v14  ;;  %v873_v14 = vld [vmem:[%s2182_s4 + $0x58] sm:$0xff] }
 0x256   : > { %1508 = vmatprep.mubr.f32.mxu0 %v699_v15 }
 0x259   : > { %1509 = vmatmul.mubr.f32.gmra.mxu0 %v700_v16 }
 0x2fd   : > { %v1489_v18 = vpop.f32.mrf.mxu0 }
 0x2ff   : > { %v783_v19 = vpop.f32.mrf.mxu0 }
 0x301   : > { %v1492_v20 = vpop.f32.mrf.mxu0 }
 0x303   : > { %v793_v21 = vpop.f32.mrf.mxu0 }
 0x305   : > { %v1495_v22 = vpop.f32.mrf.mxu0 }
 0x307   : > { %v803_v23 = vpop.f32.mrf.mxu0 }
 0x309   : > { %v1498_v24 = vpop.f32.mrf.mxu0 }
 0x30b   : > { %v813_v25 = vpop.f32.mrf.mxu0 }
 0x30d   : > { %v1501_v26 = vpop.f32.mrf.mxu0 }
 0x30f   : > { %v823_v27 = vpop.f32.mrf.mxu0 }
 0x311   : > { %v1504_v28 = vpop.f32.mrf.mxu0 }
 0x313   : > { %v833_v29 = vpop.f32.mrf.mxu0 }
 0x315   : > { %v1507_v30 = vpop.f32.mrf.mxu0 }
 0x317   : > { %v843_v31 = vpop.f32.mrf.mxu0 }
 0x319   : > { %v1510_v32 = vpop.f32.mrf.mxu0 }
 0x31a   : > { %1511 = vmatprep.subr.mxu1 %v1510_v32 }
 0x31b   : > { %v853_v33 = vpop.f32.mrf.mxu0  ;;  %1512 = vmatpush3.msra.mxu1 %v1510_v32 }
 0x31c   : > { %1513 = vmatprep.subr.mxu1 %v853_v33 }
 0x31d   : > { %1514 = vmatpush3.msra.mxu1 %v853_v33 }
 0x31e   : > { %1515 = vmatprep.subr.mxu1 %v1507_v30 }
 0x31f   : > { %1516 = vmatpush3.msra.mxu1 %v1507_v30 }
 0x320   : > { %1517 = vmatprep.subr.mxu1 %v843_v31 }
 0x321   : > { %1518 = vmatpush3.msra.mxu1 %v843_v31 }
 0x322   : > { %1519 = vmatprep.subr.mxu1 %v1504_v28 }
 0x323   : > { %1520 = vmatpush3.msra.mxu1 %v1504_v28 }
 0x324   : > { %1521 = vmatprep.subr.mxu1 %v833_v29 }
 0x325   : > { %1522 = vmatpush3.msra.mxu1 %v833_v29  ;;  %v876_v29 = vld [vmem:[%s2182_s4 + $0x70] sm:$0xff] }
 0x326   : > { %1523 = vmatprep.subr.mxu1 %v1501_v26 }
 0x327   : > { %1524 = vmatpush3.msra.mxu1 %v1501_v26  ;;  %v877_v26 = vld [vmem:[%s2182_s4 + $0x78] sm:$0xff] }
 0x328   : > { %1525 = vmatprep.subr.mxu1 %v823_v27 }
 0x329   : > { %1526 = vmatpush3.msra.mxu1 %v823_v27 }
 0x32a   : > { %1527 = vmatprep.subr.mxu1 %v1498_v24 }
 0x32b   : > { %1528 = vmatpush3.msra.mxu1 %v1498_v24 }
 0x32c   : > { %1529 = vmatprep.subr.mxu1 %v813_v25 }
 0x32d   : > { %1530 = vmatpush3.msra.mxu1 %v813_v25 }
 0x32e   : > { %1531 = vmatprep.subr.mxu1 %v1495_v22 }
 0x32f   : > { %1532 = vmatpush3.msra.mxu1 %v1495_v22 }
 0x330   : > { %1533 = vmatprep.subr.mxu1 %v803_v23 }
 0x331   : > { %1534 = vmatpush3.msra.mxu1 %v803_v23  ;;  %v874_v23 = vld [vmem:[%s2182_s4 + $0x60] sm:$0xff] }
 0x332   : > { %1535 = vmatprep.subr.mxu1 %v1492_v20 }
 0x333   : > { %1536 = vmatpush3.msra.mxu1 %v1492_v20  ;;  %v875_v20 = vld [vmem:[%s2182_s4 + $0x68] sm:$0xff] }
 0x334   : > { %1537 = vmatprep.subr.mxu1 %v793_v21 }
 0x335   : > { %1538 = vmatpush3.msra.mxu1 %v793_v21 }
 0x336   : > { %1539 = vmatprep.subr.mxu1 %v1489_v18 }
 0x337   : > { %1540 = vmatpush3.msra.mxu1 %v1489_v18 }
 0x338   : > { %1541 = vmatprep.subr.mxu1 %v783_v19 }
 0x339   : > { %1542 = vmatpush3.msra.mxu1 %v783_v19 }
 0x33a   : > { %1544 = vmatmul.mubr.f32.vlgmr.msra.gmra.mxu1 %v879_v34 }
 0x33b   : > { %1546 = vmatprep.mubr.f32.mxu1 %v880_v35 }
 0x33e   : > { %1547 = vmatmul.mubr.f32.gmra.mxu1 %v881_v36 }
 0x33f   : > { %1549 = vmatprep.mubr.f32.mxu1 %v882_v37 }
 0x342   : > { %1550 = vmatmul.mubr.f32.gmra.mxu1 %v883_v38 }
 0x343   : > { %1552 = vmatprep.mubr.f32.mxu1 %v884_v39 }
 0x346   : > { %1553 = vmatmul.mubr.f32.gmra.mxu1 %v885_v40 }
 0x347   : > { %1555 = vmatprep.mubr.f32.mxu1 %v886_v41 }
 0x34a   : > { %1556 = vmatmul.mubr.f32.gmra.mxu1 %v887_v42 }
 0x34b   : > { %1558 = vmatprep.mubr.f32.mxu1 %v888_v43 }
 0x34e   : > { %1559 = vmatmul.mubr.f32.gmra.mxu1 %v889_v44 }
 0x34f   : > { %1561 = vmatprep.mubr.f32.mxu1 %v890_v45 }
 0x352   : > { %1562 = vmatmul.mubr.f32.gmra.mxu1 %v891_v46 }
 0x353   : > { %1564 = vmatprep.mubr.f32.mxu1 %v892_v47 }
 0x356   : > { %1565 = vmatmul.mubr.f32.gmra.mxu1 %v893_v48 }
 0x3fa   : > { %v1545_v50 = vpop.f32.mrf.mxu1 }
 0x3fb   : > { %v1040_v52 = vadd.f32 %v1545_v50, %v863_v49 }
 0x3fc   : > { %v960_v53 = vpop.f32.mrf.mxu1 }
 0x3fd   : > { %1056 = vst [vmem:[%s2182_s4 + $0x8] sm:$0xff] %v1040_v52  ;;  %v1039_v55 = vadd.f32 %v960_v53, %v862_v51 }
 0x3fe   : > { %v1548_v56 = vpop.f32.mrf.mxu1 }
 0x3ff   : > { %1055 = vst [vmem:[%s2182_s4] sm:$0xff] %v1039_v55  ;;  %v1042_v58 = vadd.f32 %v1548_v56, %v865_v54 }
 0x400   : > { %v970_v59 = vpop.f32.mrf.mxu1 }
 0x401   : > { %1058 = vst [vmem:[%s2182_s4 + $0x18] sm:$0xff] %v1042_v58  ;;  %v1041_v61 = vadd.f32 %v970_v59, %v864_v57 }
 0x402   : > { %v1551_v62 = vpop.f32.mrf.mxu1 }
 0x403   : > { %1057 = vst [vmem:[%s2182_s4 + $0x10] sm:$0xff] %v1041_v61  ;;  %v1044_v0 = vadd.f32 %v1551_v62, %v867_v60 }
 0x404   : > { %v980_v1 = vpop.f32.mrf.mxu1 }
 0x405   : > { %1060 = vst [vmem:[%s2182_s4 + $0x28] sm:$0xff] %v1044_v0  ;;  %v1043_v3 = vadd.f32 %v980_v1, %v866_v63 }
 0x406   : > { %v1554_v4 = vpop.f32.mrf.mxu1 }
 0x407   : > { %1059 = vst [vmem:[%s2182_s4 + $0x20] sm:$0xff] %v1043_v3  ;;  %v1046_v6 = vadd.f32 %v1554_v4, %v869_v2 }
 0x408   : > { %v990_v7 = vpop.f32.mrf.mxu1 }
 0x409   : > { %1062 = vst [vmem:[%s2182_s4 + $0x38] sm:$0xff] %v1046_v6  ;;  %v1045_v9 = vadd.f32 %v990_v7, %v868_v5 }
 0x40a   : > { %v1557_v10 = vpop.f32.mrf.mxu1 }
 0x40b   : > { %1061 = vst [vmem:[%s2182_s4 + $0x30] sm:$0xff] %v1045_v9  ;;  %v1048_v12 = vadd.f32 %v1557_v10, %v871_v8 }
 0x40c   : > { %v1000_v13 = vpop.f32.mrf.mxu1 }
 0x40d   : > { %1064 = vst [vmem:[%s2182_s4 + $0x48] sm:$0xff] %v1048_v12  ;;  %v1047_v15 = vadd.f32 %v1000_v13, %v870_v11 }
 0x40e   : > { %v1560_v16 = vpop.f32.mrf.mxu1 }
 0x40f   : > { %1063 = vst [vmem:[%s2182_s4 + $0x40] sm:$0xff] %v1047_v15  ;;  %v1050_v18 = vadd.f32 %v1560_v16, %v873_v14 }
 0x410   : > { %v1010_v19 = vpop.f32.mrf.mxu1 }
 0x411   : > { %1066 = vst [vmem:[%s2182_s4 + $0x58] sm:$0xff] %v1050_v18  ;;  %v1049_v21 = vadd.f32 %v1010_v19, %v872_v17 }
 0x412   : > { %v1563_v22 = vpop.f32.mrf.mxu1 }
 0x413   : > { %1065 = vst [vmem:[%s2182_s4 + $0x50] sm:$0xff] %v1049_v21  ;;  %v1052_v24 = vadd.f32 %v1563_v22, %v875_v20 }
 0x414   : > { %v1020_v25 = vpop.f32.mrf.mxu1 }
 0x415   : > { %1068 = vst [vmem:[%s2182_s4 + $0x68] sm:$0xff] %v1052_v24  ;;  %v1051_v27 = vadd.f32 %v1020_v25, %v874_v23 }
 0x416   : > { %v1566_v28 = vpop.f32.mrf.mxu1 }
 0x417   : > { %1067 = vst [vmem:[%s2182_s4 + $0x60] sm:$0xff] %v1051_v27  ;;  %v1054_v30 = vadd.f32 %v1566_v28, %v877_v26 }
 0x418   : > { %v1030_v31 = vpop.f32.mrf.mxu1 }
 0x419   : > { %1070 = vst [vmem:[%s2182_s4 + $0x78] sm:$0xff] %v1054_v30  ;;  %v1053_v32 = vadd.f32 %v1030_v31, %v876_v29 }
 0x41b   : > { %1069 = vst [vmem:[%s2182_s4 + $0x70] sm:$0xff] %v1053_v32 }
 0x41c PF: > { %p1071_p8 = scmp.lt.s32.totalorder %s1606_s15, 2 }
 0x41d   : > { %v1076_v33 = vld [vmem:[%s2182_s4] sm:$0xff] (%p1071_p8)  ;;  %v1077_v34 = vld [vmem:[%s2182_s4 + $0x8] sm:$0xff] (%p1071_p8)  ;;  %v1078_v35 = vld [vmem:[%s2182_s4 + $0x10] sm:$0xff] (%p1071_p8) }
 0x41e   : > { %1075 = sbr.rel (!%p1071_p8) target bundleno = 1065 (0x429), region = 52  ;;  %v1092_v36 = vmax.f32 (%p1071_p8), %v1076_v33, 0.0  ;;  %v1093_v37 = vmax.f32 (%p1071_p8), %v1077_v34, 0.0  ;;  %v1094_v38 = vmax.f32 (%p1071_p8), %v1078_v35, 0.0  ;;  %v1079_v39 = vld [vmem:[%s2182_s4 + $0x18] sm:$0xff] (%p1071_p8)  ;;  %v1080_v40 = vld [vmem:[%s2182_s4 + $0x20] sm:$0xff] (%p1071_p8) }
 0x41f   : > { %v1081_v41 = vld [vmem:[%s2182_s4 + $0x28] sm:$0xff] (%p1071_p8)  ;;  %v1095_v42 = vmax.f32 (%p1071_p8), %v1079_v39, 0.0  ;;  %v1096_v43 = vmax.f32 (%p1071_p8), %v1080_v40, 0.0  ;;  %v1082_v45 = vld [vmem:[%s2182_s4 + $0x30] sm:$0xff] (%p1071_p8)  ;;  %v1083_v46 = vld [vmem:[%s2182_s4 + $0x38] sm:$0xff] (%p1071_p8) }
 0x420   : > { %v1097_v44 = vmax.f32 (%p1071_p8), %v1081_v41, 0.0  ;;  %v1084_v47 = vld [vmem:[%s2182_s4 + $0x40] sm:$0xff] (%p1071_p8)  ;;  %1108 = vst [vmem:[#allocation2 + $0x30] sm:$0xff] (%p1071_p8), %v1092_v36  ;;  %1109 = vst [vmem:[#allocation2] sm:$0xff] (%p1071_p8), %v1093_v37  ;;  %v1098_v48 = vmax.f32 (%p1071_p8), %v1082_v45, 0.0  ;;  %v1099_v49 = vmax.f32 (%p1071_p8), %v1083_v46, 0.0 }
 0x421   : > { %1110 = vst [vmem:[#allocation2 + $0x58] sm:$0xff] (%p1071_p8), %v1094_v38  ;;  %v1100_v50 = vmax.f32 (%p1071_p8), %v1084_v47, 0.0  ;;  %v1085_v51 = vld [vmem:[%s2182_s4 + $0x48] sm:$0xff] (%p1071_p8)  ;;  %v1086_v52 = vld [vmem:[%s2182_s4 + $0x50] sm:$0xff] (%p1071_p8)  ;;  %v1087_v53 = vld [vmem:[%s2182_s4 + $0x58] sm:$0xff] (%p1071_p8) }
 0x422   : > { %1111 = vst [vmem:[#allocation2 + $0x18] sm:$0xff] (%p1071_p8), %v1095_v42  ;;  %1112 = vst [vmem:[#allocation2 + $0x50] sm:$0xff] (%p1071_p8), %v1096_v43  ;;  %v1101_v54 = vmax.f32 (%p1071_p8), %v1085_v51, 0.0  ;;  %v1102_v55 = vmax.f32 (%p1071_p8), %v1086_v52, 0.0  ;;  %v1103_v56 = vmax.f32 (%p1071_p8), %v1087_v53, 0.0  ;;  %v1088_v57 = vld [vmem:[%s2182_s4 + $0x60] sm:$0xff] (%p1071_p8) }
 0x423   : > { %1113 = vst [vmem:[#allocation2 + $0x68] sm:$0xff] %v1097_v44  ;;  %v1089_v58 = vld [vmem:[%s2182_s4 + $0x68] sm:$0xff]  ;;  %v1090_v59 = vld [vmem:[%s2182_s4 + $0x70] sm:$0xff]  ;;  %1114 = vst [vmem:[#allocation2 + $0x8] sm:$0xff] %v1098_v48  ;;  %v1104_v60 = vmax.f32 %v1088_v57, 0.0 }
 0x424   : > { %1115 = vst [vmem:[#allocation2 + $0x48] sm:$0xff] %v1099_v49  ;;  %1116 = vst [vmem:[#allocation2 + $0x40] sm:$0xff] %v1100_v50  ;;  %v1105_v61 = vmax.f32 %v1089_v58, 0.0  ;;  %v1106_v62 = vmax.f32 %v1090_v59, 0.0  ;;  %v1091_v63 = vld [vmem:[%s2182_s4 + $0x78] sm:$0xff] }
 0x425   : > { %1117 = vst [vmem:[#allocation2 + $0x20] sm:$0xff] %v1101_v54  ;;  %1118 = vst [vmem:[#allocation2 + $0x10] sm:$0xff] %v1102_v55  ;;  %v1107_v0 = vmax.f32 %v1091_v63, 0.0 }
 0x426   : > { %1119 = vst [vmem:[#allocation2 + $0x38] sm:$0xff] %v1103_v56  ;;  %1120 = vst [vmem:[#allocation2 + $0x60] sm:$0xff] %v1104_v60 }
 0x427   : > { %1121 = vst [vmem:[#allocation2 + $0x70] sm:$0xff] %v1105_v61  ;;  %1122 = vst [vmem:[#allocation2 + $0x78] sm:$0xff] %v1106_v62 }
 0x428   : > { %1123 = vst [vmem:[#allocation2 + $0x28] sm:$0xff] %v1107_v0 }
 0x429 PF: > { %s14_s17 = sadd.s32 1, %s1614_s17   ;;  %s2183_s15 = smov %s1610_s16 }
 0x42a   : > { %p11_p9 = scmp.ge.s32.totalorder %s14_s17, 5   ;;  %s2184_s16 = smov %s2186_s18 }
 0x42c   :  { %13 = sbr.rel (!%p11_p9) target bundleno = 2 (0x2), region = 85 }

</bundles_post_ra>
